<compile_context>
chip_gen: v5e
topology: v5e:2x2
jax: 0.10.0
libtpu: 0.0.40
codegen_flags: <defaults>
</compile_context>

<pallas_src>
import jax
import jax.numpy as jnp
from jax.experimental import pallas as pl
from jax.experimental.pallas import tpu as pltpu

_INV_SQRT2 = 0.7071067811865476  # 1/sqrt(2), hoisted constant for exact GELU.


def _round_up(v, m):
    return ((v + m - 1) // m) * m


def _embed_fc_kernel(x_ref, w1_ref, b1_ref, w2_ref, b2_ref, o_ref):
    # First linear on the MXU, f32 accumulation.
    h = jnp.dot(x_ref[...], w1_ref[...], preferred_element_type=jnp.float32)
    h = h + b1_ref[...]  # bias broadcast once per tile (f32)
    # Exact GELU (matches PyTorch nn.GELU() default, approximate='none'):
    #   0.5 * x * (1 + erf(x / sqrt(2)))   -- kept in f32 on the VPU.
    h = 0.5 * h * (1.0 + jax.lax.erf(h * _INV_SQRT2))
    # Second linear; cast activations to the MXU operand dtype (no-op in f32
    # mode, bf16 when mxu_dtype=bf16), accumulate in f32.
    out = jnp.dot(h.astype(w2_ref.dtype), w2_ref[...],
                  preferred_element_type=jnp.float32)
    out = out + b2_ref[...]
    o_ref[...] = out.astype(o_ref.dtype)


def embed_fc(x, w1, b1, w2, b2, *, tile_n=256, mxu_dtype=None):
    """Forward pass of EmbedFC: y = GELU(x @ w1 + b1) @ w2 + b2.

    x  : [..., input_dim]      (flattened like x.view(-1, input_dim))
    w1 : [input_dim, emb_dim]  (transpose of PyTorch nn.Linear.weight)
    b1 : [emb_dim]
    w2 : [emb_dim, emb_dim]
    b2 : [emb_dim]
    tile_n    : row-tile size (rounded to a multiple of 8).
    mxu_dtype : optional matmul-operand dtype (e.g. jnp.bfloat16); bias add,
                GELU and accumulation stay f32.
    Returns [N, emb_dim] with N = prod(leading dims of x).
    """
    input_dim, emb_dim = w1.shape
    out_dtype = x.dtype
    x2d = x.reshape(-1, input_dim)  # == x.view(-1, input_dim)
    n = x2d.shape[0]

    # ---- lane-dense embedding axis: pad to a multiple of 128 lanes. The
    # padded columns/rows are zero, contribute nothing, and are sliced off.
    e_pad = _round_up(emb_dim, 128)
    if e_pad != emb_dim:
        pe = e_pad - emb_dim
        w1 = jnp.pad(w1, ((0, 0), (0, pe)))
        b1 = jnp.pad(b1, (0, pe))
        w2 = jnp.pad(w2, ((0, pe), (0, pe)))
        b2 = jnp.pad(b2, (0, pe))
    b1_2d = b1.reshape(1, e_pad).astype(jnp.float32)
    b2_2d = b2.reshape(1, e_pad).astype(jnp.float32)

    # ---- row tiling: round tile to a sublane multiple, pad N up to the tile.
    tile_n = _round_up(max(8, min(int(tile_n), n)), 8)
    n_pad = _round_up(n, tile_n)
    if n_pad != n:
        x2d = jnp.pad(x2d, ((0, n_pad - n), (0, 0)))

    # ---- optional bf16 MXU operands (activations & weights only).
    if mxu_dtype is not None:
        x2d = x2d.astype(mxu_dtype)
        w1 = w1.astype(mxu_dtype)
        w2 = w2.astype(mxu_dtype)

    grid = (n_pad // tile_n,)

    # ---- VMEM budget: x/out tiles double-buffered, weights resident once,
    # f32 intermediates. Clamp to stay well inside v7x's 64 MiB physical VMEM.
    est = (2 * tile_n * input_dim * x2d.dtype.itemsize        # x tile (x2 bufs)
           + 2 * tile_n * e_pad * jnp.dtype(out_dtype).itemsize  # out tile
           + 2 * (input_dim * e_pad + e_pad * e_pad) * w1.dtype.itemsize
           + 2 * 2 * e_pad * 4                                # biases
           + 2 * tile_n * e_pad * 4)                          # f32 temps
    vmem_limit = int(min(max(4 * est, 16 * 1024 * 1024), 48 * 1024 * 1024))

    out = pl.pallas_call(
        _embed_fc_kernel,
        out_shape=jax.ShapeDtypeStruct((n_pad, e_pad), out_dtype),
        grid_spec=pltpu.PrefetchScalarGridSpec(
            num_scalar_prefetch=0,
            grid=grid,
            in_specs=[
                pl.BlockSpec((tile_n, input_dim), lambda i: (i, 0)),   # x rows
                pl.BlockSpec((input_dim, e_pad), lambda i: (0, 0)),    # w1 (resident)
                pl.BlockSpec((1, e_pad), lambda i: (0, 0)),            # b1 (resident)
                pl.BlockSpec((e_pad, e_pad), lambda i: (0, 0)),        # w2 (resident)
                pl.BlockSpec((1, e_pad), lambda i: (0, 0)),            # b2 (resident)
            ],
            out_specs=pl.BlockSpec((tile_n, e_pad), lambda i: (i, 0)),
        ),
        compiler_params=pltpu.CompilerParams(
            dimension_semantics=("parallel",),  # megacore row-sharding on v7x
            vmem_limit_bytes=vmem_limit,
        ),
    )(x2d, w1, b1_2d, w2, b2_2d)

    # Drop padded rows and padded embedding columns.
    return out[:n, :emb_dim]


def _init_linear(key, fan_in, fan_out, dtype=jnp.float32):
    """Deterministic init mimicking nn.Linear default (uniform +-1/sqrt(fan_in))."""
    kw, kb = jax.random.split(key)
    bound = 1.0 / jnp.sqrt(float(fan_in))
    w = jax.random.uniform(kw, (fan_in, fan_out), dtype, minval=-bound, maxval=bound)
    b = jax.random.uniform(kb, (fan_out,), dtype, minval=-bound, maxval=bound)
    return w, b


if __name__ == "__main__":
    input_dim = 16
    emb_dim = 32

    key = jax.random.PRNGKey(0)
    kx, k1, k2, kx2 = jax.random.split(key, 4)

    # Example input consistent with the module: leading dims are flattened by
    # x.view(-1, input_dim):  [2, 4, 16] -> [8, 16]
    x = jax.random.normal(kx, (2, 4, input_dim), dtype=jnp.float32)
    w1, b1 = _init_linear(k1, input_dim, emb_dim)
    w2, b2 = _init_linear(k2, emb_dim, emb_dim)

    def reference(xv):
        x2 = xv.reshape(-1, input_dim)
        h = x2 @ w1 + b1
        h = 0.5 * h * (1.0 + jax.lax.erf(h / jnp.sqrt(2.0)))
        return h @ w2 + b2

    # f32 path (exact PyTorch semantics).
    out = jax.block_until_ready(embed_fc(x, w1, b1, w2, b2))
    assert out.shape == (8, emb_dim)
    assert jnp.allclose(out, reference(x), atol=1e-5, rtol=1e-5)

    # Multi-tile path (exercises row tiling + row padding: 40 rows, tile 16).
    x_big = jax.random.normal(kx2, (40, input_dim), dtype=jnp.float32)
    out_big = jax.block_until_ready(embed_fc(x_big, w1, b1, w2, b2, tile_n=16))
    assert out_big.shape == (40, emb_dim)
    assert jnp.allclose(out_big, reference(x_big), atol=1e-5, rtol=1e-5)

    # bf16 MXU operands with f32 accumulation (looser tolerance vs f32 ref).
    out_bf16 = jax.block_until_ready(
        embed_fc(x_big, w1, b1, w2, b2, tile_n=16, mxu_dtype=jnp.bfloat16))
    assert jnp.allclose(out_bf16, reference(x_big), atol=5e-2, rtol=5e-2)

    print("KERNEL_OK")
</pallas_src>

<mosaic_0001>
module attributes {stable_mosaic.version = 11 : i64} {
  func.func @_embed_fc_kernel(%arg0: i32, %arg1: memref<8x16xf32, #tpu.memory_space<vmem>>, %arg2: memref<16x128xf32, #tpu.memory_space<vmem>>, %arg3: memref<1x128xf32, #tpu.memory_space<vmem>>, %arg4: memref<128x128xf32, #tpu.memory_space<vmem>>, %arg5: memref<1x128xf32, #tpu.memory_space<vmem>>, %arg6: memref<8x128xf32, #tpu.memory_space<vmem>>) attributes {dimension_semantics = [#tpu.dimension_semantics<parallel>], iteration_bounds = array<i64: 1>, scalar_prefetch = 0 : i64, scratch_operands = 0 : i64, tpu.core_type = #tpu.core_type<tc>, window_params = [{transform_indices = @transform_0, window_bounds = array<i64: 8, 16>}, {pipeline_mode = #tpu.pipeline_mode<synchronous>, transform_indices = @transform_1, window_bounds = array<i64: 16, 128>}, {pipeline_mode = #tpu.pipeline_mode<synchronous>, transform_indices = @transform_2, window_bounds = array<i64: 1, 128>}, {pipeline_mode = #tpu.pipeline_mode<synchronous>, transform_indices = @transform_3, window_bounds = array<i64: 128, 128>}, {pipeline_mode = #tpu.pipeline_mode<synchronous>, transform_indices = @transform_4, window_bounds = array<i64: 1, 128>}, {transform_indices = @transform_5, window_bounds = array<i64: 8, 128>}]} {
    %c0 = arith.constant 0 : index
    %c0_0 = arith.constant 0 : index
    %0 = vector.load %arg1[%c0, %c0_0] : memref<8x16xf32, #tpu.memory_space<vmem>>, vector<8x16xf32>
    %c0_1 = arith.constant 0 : index
    %c0_2 = arith.constant 0 : index
    %1 = vector.load %arg2[%c0_1, %c0_2] : memref<16x128xf32, #tpu.memory_space<vmem>>, vector<16x128xf32>
    %cst = arith.constant dense<0.000000e+00> : vector<8x128xf32>
    %2 = tpu.matmul %0, %1, %cst {dimension_numbers = #tpu.dot_dimension_numbers<[1], [0], [0], [1], [0, 0, 1, 1], [], []>} : vector<8x16xf32>, vector<16x128xf32>, vector<8x128xf32> -> vector<8x128xf32>
    %c0_3 = arith.constant 0 : index
    %c0_4 = arith.constant 0 : index
    %3 = vector.load %arg3[%c0_3, %c0_4] : memref<1x128xf32, #tpu.memory_space<vmem>>, vector<1x128xf32>
    %4 = vector.broadcast %3 : vector<1x128xf32> to vector<8x128xf32>
    %5 = arith.addf %2, %4 : vector<8x128xf32>
    %cst_5 = arith.constant 5.000000e-01 : f32
    %6 = vector.broadcast %cst_5 : f32 to vector<8x128xf32>
    %7 = arith.mulf %6, %5 : vector<8x128xf32>
    %cst_6 = arith.constant 0.707106769 : f32
    %8 = vector.broadcast %cst_6 : f32 to vector<8x128xf32>
    %9 = arith.mulf %5, %8 : vector<8x128xf32>
    %10 = math.erf %9 : vector<8x128xf32>
    %cst_7 = arith.constant 1.000000e+00 : f32
    %11 = vector.broadcast %cst_7 : f32 to vector<8x128xf32>
    %12 = arith.addf %11, %10 : vector<8x128xf32>
    %13 = arith.mulf %7, %12 : vector<8x128xf32>
    %c0_8 = arith.constant 0 : index
    %c0_9 = arith.constant 0 : index
    %14 = vector.load %arg4[%c0_8, %c0_9] : memref<128x128xf32, #tpu.memory_space<vmem>>, vector<128x128xf32>
    %cst_10 = arith.constant dense<0.000000e+00> : vector<8x128xf32>
    %15 = tpu.matmul %13, %14, %cst_10 {dimension_numbers = #tpu.dot_dimension_numbers<[1], [0], [0], [1], [0, 0, 1, 1], [], []>} : vector<8x128xf32>, vector<128x128xf32>, vector<8x128xf32> -> vector<8x128xf32>
    %c0_11 = arith.constant 0 : index
    %c0_12 = arith.constant 0 : index
    %16 = vector.load %arg5[%c0_11, %c0_12] : memref<1x128xf32, #tpu.memory_space<vmem>>, vector<1x128xf32>
    %17 = vector.broadcast %16 : vector<1x128xf32> to vector<8x128xf32>
    %18 = arith.addf %15, %17 : vector<8x128xf32>
    %c0_13 = arith.constant 0 : index
    %c0_14 = arith.constant 0 : index
    %19 = vector.load %arg6[%c0_13, %c0_14] : memref<8x128xf32, #tpu.memory_space<vmem>>, vector<8x128xf32>
    tpu.vector_store %arg6[%c0_13, %c0_14], %18 {strides = array<i32>} : memref<8x128xf32, #tpu.memory_space<vmem>>, vector<8x128xf32>,
    return
  }
  func.func @transform_0(%arg0: i32) -> (i32, i32) {
    %c0_i32 = arith.constant 0 : i32
    %c0_i32_0 = arith.constant 0 : i32
    return %arg0, %c0_i32 : i32, i32
  }
  func.func @transform_1(%arg0: i32) -> (i32, i32) {
    %c0_i32 = arith.constant 0 : i32
    %c0_i32_0 = arith.constant 0 : i32
    %c0_i32_1 = arith.constant 0 : i32
    return %c0_i32, %c0_i32_0 : i32, i32
  }
  func.func @transform_2(%arg0: i32) -> (i32, i32) {
    %c0_i32 = arith.constant 0 : i32
    %c0_i32_0 = arith.constant 0 : i32
    %c0_i32_1 = arith.constant 0 : i32
    return %c0_i32, %c0_i32_0 : i32, i32
  }
  func.func @transform_3(%arg0: i32) -> (i32, i32) {
    %c0_i32 = arith.constant 0 : i32
    %c0_i32_0 = arith.constant 0 : i32
    %c0_i32_1 = arith.constant 0 : i32
    return %c0_i32, %c0_i32_0 : i32, i32
  }
  func.func @transform_4(%arg0: i32) -> (i32, i32) {
    %c0_i32 = arith.constant 0 : i32
    %c0_i32_0 = arith.constant 0 : i32
    %c0_i32_1 = arith.constant 0 : i32
    return %c0_i32, %c0_i32_0 : i32, i32
  }
  func.func @transform_5(%arg0: i32) -> (i32, i32) {
    %c0_i32 = arith.constant 0 : i32
    %c0_i32_0 = arith.constant 0 : i32
    return %arg0, %c0_i32 : i32, i32
  }
}

</mosaic_0001>

<bundles_post_ra>
// kernel: tpu_custom_call.1
= control target key start
LH: loop header
LB: loop body
LE: loop exit
PB: predicated region body
PF: predicated region fallthrough
CT: control target
= control target key end

     0   :  { %10 = vsyncpa [#allocation3], 0  ;;  %s368_s0 = inlined_call_operand.hbm [shape: f32[8,16], index: 0, kind: input, shape index: {}]   ;;  %s369_s1 = inlined_call_operand.hbm [shape: f32[16,128], index: 1, kind: input, shape index: {}]   ;;  %s370_s2 = inlined_call_operand.vmem [shape: f32[1,128], index: 2, kind: input, shape index: {}]   ;;  %s371_s3 = inlined_call_operand.hbm [shape: f32[128,128], index: 3, kind: input, shape index: {}]   ;;  %s372_s4 = inlined_call_operand.vmem [shape: f32[1,128], index: 4, kind: input, shape index: {}]   ;;  %s373_s5 = inlined_call_operand.hbm [shape: f32[8,128], index: 5, kind: output, shape index: {}]  }
   0x1   :  { %11 = vsyncpa [#allocation6], 0  ;;  %s28_s20 = sshll.u32 %s369_s1, 4  ;;  %s29_s20 = int_to_ptr.hbm [resolvable:$true] %s28_s20 }
   0x2   :  { %12 = vsyncpa [#allocation4], 0  ;;  %s314_s21 = smov [#allocation5]   ;;  %s18_s25 = sshll.u32 %s368_s0, 4  ;;  %s19_s25 = int_to_ptr.hbm [resolvable:$true] %s18_s25 }
   0x3   :  { %s30_s22 = sshll.u32 %s314_s21, 4  ;;  %s315_s26 = smov 128   ;;  %s31_s22 = int_to_ptr.vmem [resolvable:$true] %s30_s22 }
   0x4   :  { %s316_s27 = smov 8   ;;  %s317_s28 = smov [#allocation2]  }
   0x5   :  { %36 = dma.hbm_to_vmem [thread:$0]  %s29_s20, 256, %s31_s22, [#allocation6], %s315_s26, %s315_s26, %s316_s27  }
   0x6   :  { %s20_s29 = sshll.u32 %s317_s28, 4  ;;  %s43_s7 = sshll.u32 %s371_s3, 4  ;;  %s21_s29 = int_to_ptr.vmem [resolvable:$true] %s20_s29  ;;  %s44_s7 = int_to_ptr.hbm [resolvable:$true] %s43_s7 }
   0x7   :  { %23 = dma.hbm_to_vmem [thread:$0]  %s19_s25, 128, %s21_s29, [#allocation3]  }
   0x8   :  { %s318_s1 = smov [#allocation7]  }
   0x9   :  { %s45_s8 = sshll.u32 %s318_s1, 4  ;;  %s46_s8 = int_to_ptr.vmem [resolvable:$true] %s45_s8 }
   0xa   :  { %51 = dma.hbm_to_vmem [thread:$0]  %s44_s7, 2048, %s46_s8, [#allocation6], %s315_s26, %s315_s26, %s316_s27  }
   0xb   :  { %308 = dma.done.wait [#allocation3], 128  }
   0xc   :  { %309 = vsyncadd [#allocation3], 4294967168 }
   0xd   :  { %310 = dma.done.wait [#allocation6], 2304  }
   0xe   :  { %311 = vsyncadd [#allocation6], 4294964992  ;;  %v68_v0 = vld [vmem:[#allocation5 + $0x8] sm:$0xff]  ;;  %v67_v1 = vld [vmem:[#allocation5] sm:$0xff]  ;;  %vm73_vm0 = vcmask 130048   ;;  %s319_s10 = smov [#allocation8]  }
   0xf   :  { %91 = vmatpush.msra.mxu0 %v68_v0  ;;  %v66_v2 = vld [vmem:[#allocation2] sm:$0xff]  ;;  %v156_v3 = vld [vmem:[#allocation7 + $0x78] sm:$0xff]  ;;  %v155_v4 = vld [vmem:[#allocation7 + $0x70] sm:$0xff]  ;;  %s187_s11 = sshll.u32 %s319_s10, 4  ;;  %s189_s14 = sshll.u32 %s373_s5, 4  ;;  %s188_s11 = int_to_ptr.vmem [resolvable:$true] %s187_s11  ;;  %s190_s14 = int_to_ptr.hbm [resolvable:$true] %s189_s14 }
  0x10   :  { %161 = vmatpush.msra.mxu1 %v156_v3  ;;  %v154_v5 = vld [vmem:[#allocation7 + $0x68] sm:$0xff]  ;;  %v153_v6 = vld [vmem:[#allocation7 + $0x60] sm:$0xff]  ;;  %v152_v8 = vld [vmem:[#allocation7 + $0x58] sm:$0xff] }
  0x11   :  { %92 = vmatpush.msra.mxu0 %v67_v1  ;;  %v208_v7 = vld [vmem:[%s370_s2] ss:$0 sm:$0xff]  ;;  %v151_v9 = vld [vmem:[#allocation7 + $0x50] sm:$0xff]  ;;  %v149_v13 = vld [vmem:[#allocation7 + $0x40] sm:$0xff] }
  0x12   :  { %200 = vmatmul.msk.f32.vlgmr.msra.gmra.mxu0 %vm73_vm0, %v66_v2  ;;  %162 = vmatpush.msra.mxu1 %v155_v4  ;;  %v150_v11 = vld [vmem:[#allocation7 + $0x48] sm:$0xff]  ;;  %v148_v15 = vld [vmem:[#allocation7 + $0x38] sm:$0xff]  ;;  %v147_v17 = vld [vmem:[#allocation7 + $0x30] sm:$0xff] }
  0x13   :  { %v146_v19 = vld [vmem:[#allocation7 + $0x28] sm:$0xff]  ;;  %v145_v22 = vld [vmem:[#allocation7 + $0x20] sm:$0xff]  ;;  %v144_v25 = vld [vmem:[#allocation7 + $0x18] sm:$0xff] }
  0x14   :  { %163 = vmatpush.msra.mxu1 %v154_v5  ;;  %v143_v28 = vld [vmem:[#allocation7 + $0x10] sm:$0xff]  ;;  %v142_v31 = vld [vmem:[#allocation7 + $0x8] sm:$0xff]  ;;  %v141_v33 = vld [vmem:[#allocation7] sm:$0xff] }
  0x15   :  { %v209_v61 = vld [vmem:[%s372_s4] ss:$0 sm:$0xff] }
  0x16   :  { %164 = vmatpush.msra.mxu1 %v153_v6 }
  0x18   :  { %165 = vmatpush.msra.mxu1 %v152_v8 }
  0x1a   :  { %166 = vmatpush.msra.mxu1 %v151_v9 }
  0x1c   :  { %167 = vmatpush.msra.mxu1 %v150_v11 }
  0x1e   :  { %168 = vmatpush.msra.mxu1 %v149_v13 }
  0x20   :  { %169 = vmatpush.msra.mxu1 %v148_v15 }
  0x22   :  { %170 = vmatpush.msra.mxu1 %v147_v17 }
  0x24   :  { %171 = vmatpush.msra.mxu1 %v146_v19 }
  0x26   :  { %172 = vmatpush.msra.mxu1 %v145_v22 }
  0x28   :  { %173 = vmatpush.msra.mxu1 %v144_v25 }
  0x2a   :  { %174 = vmatpush.msra.mxu1 %v143_v28 }
  0x2c   :  { %175 = vmatpush.msra.mxu1 %v142_v31 }
  0x2e   :  { %176 = vmatpush.msra.mxu1 %v141_v33 }
  0x8f   :  { %v94_v10 = vpop.f32.mrf.mxu0 }
  0x90   :  { %v95_v12 = vadd.f32 %v208_v7, %v94_v10 }
  0x92   :  { %v98_v14 = vmul.f32 0.70710677, %v95_v12  ;;  %v97_v58 = vmul.f32 0.5, %v95_v12 }
  0x94   :  { %v99_v16 = vmul.f32 %v98_v14, %v98_v14 }
  0x96   :  { %v100_v18 = vmin.f32 %v99_v16, 16.0 }
  0x98   :  { %v101_v20 = vmul.f32 2.1237322e-06, %v100_v18  ;;  %v112_v21 = vmul.f32 3.8918573e-05, %v100_v18 }
  0x9a   :  { %v102_v23 = vadd.f32 0.00028619796, %v101_v20  ;;  %v113_v24 = vadd.f32 0.001143296, %v112_v21 }
  0x9c   :  { %v103_v26 = vmul.f32 %v102_v23, %v100_v18  ;;  %v114_v27 = vmul.f32 %v113_v24, %v100_v18 }
  0x9e   :  { %v115_v29 = vadd.f32 0.014752088, %v114_v27  ;;  %v104_v30 = vadd.f32 0.0036580483, %v103_v26 }
  0xa0   :  { %v116_v32 = vmul.f32 %v115_v29, %v100_v18  ;;  %v105_v35 = vmul.f32 %v104_v30, %v100_v18 }
  0xa2   :  { %v117_v34 = vadd.f32 0.112945676, %v116_v32  ;;  %v106_v38 = vadd.f32 0.05243302, %v105_v35 }
  0xa4   :  { %v118_v36 = vmul.f32 %v117_v34, %v100_v18  ;;  %v107_v41 = vmul.f32 %v106_v38, %v100_v18 }
  0xa6   :  { %v119_v37 = vadd.f32 0.4994258, %v118_v36  ;;  %v108_v42 = vadd.f32 0.18741608, %v107_v41 }
  0xa8   :  { %v120_v39 = vmul.f32 %v119_v37, %v100_v18  ;;  %v109_v44 = vmul.f32 %v108_v42, %v100_v18 }
  0xaa   :  { %v121_v40 = vadd.f32 1.0, %v120_v39  ;;  %v110_v48 = vadd.f32 1.1283791, %v109_v44 }
  0xac   :  { %210 = vrcp.f32 %v121_v40  ;;  %v133_v47 = vand.u32 2147483648, %v121_v40  ;;  %v131_v50 = vand.u32 2147483647, %v121_v40  ;;  %vm127_vm2 = vweird.f32 %v121_v40 }
  0xad   :  { %v111_v53 = vmul.f32 %v110_v48, %v98_v14 }
  0xae   :  { %v134_v52 = vor.u32 1.1754944e-38, %v133_v47  ;;  %vm132_vm4 = vcmp.eq.f32.partialorder %v131_v50, 8.507059e+37 }
  0xb2   :  { %v211_v43 = vpop.eup %210 }
  0xb3   :  { %v123_v45 = vmul.f32 %v211_v43, %v121_v40  ;;  %vm128_vm1 = vweird.f32 %v211_v43 }
  0xb4   :  { %vm129_vm3 = vmor %vm127_vm2, %vm128_vm1 }
  0xb5   :  { %v124_v46 = vsub.f32 1.0, %v123_v45 }
  0xb7   :  { %v125_v49 = vmul.f32 %v211_v43, %v124_v46 }
  0xb9   :  { %v126_v51 = vadd.f32 %v211_v43, %v125_v49 }
  0xbb   :  { %v130_v54 = vsel %vm129_vm3, %v211_v43, %v126_v51 }
  0xbc   :  { %v135_v55 = vsel %vm132_vm4, %v134_v52, %v130_v54 }
  0xbd   :  { %v136_v56 = vmul.f32 %v135_v55, %v111_v53 }
  0xbf   :  { %v201_v57 = vclamps-f32 %v136_v56, 1.0 }
  0xc1   :  { %v139_v59 = vadd.f32 1.0, %v201_v57 }
  0xc3   :  { %v140_v60 = vmul.f32 %v139_v59, %v97_v58 }
  0xc5   :  { %177 = vmatmul.f32.vlgmr.msra.gmra.mxu1 %v140_v60 }
 0x142   :  { %v178_v62 = vpop.f32.mrf.mxu1 }
 0x143   :  { %v179_v63 = vadd.f32 %v209_v61, %v178_v62 }
 0x145   :  { %181 = vst [vmem:[#allocation8] sm:$0xff] %v179_v63 }
 0x146   :  { %192 = dma.vmem_to_hbm [thread:$0]  %s188_s11, 128, %s190_s14, [#allocation4]  }
 0x147   :  { %312 = dma.done.wait [#allocation4], 128  }
 0x148   :  { %313 = vsyncadd [#allocation4], 4294967168 }
 0x149   :  { %197 = vsyncpa [#allocation3], 1 }
 0x14a   :  { %198 = vsyncpa [#allocation6], 1 }
 0x14b   :  { %199 = vsyncpa [#allocation4], 1 }

</bundles_post_ra>
